<compile_context>
chip_gen: v5e
topology: v5e:2x2
jax: 0.10.0
libtpu: 0.0.40
codegen_flags: <defaults>
</compile_context>

<pallas_src>
import jax
import jax.numpy as jnp
from jax import lax
from jax.experimental import pallas as pl
from jax.experimental.pallas import tpu as pltpu


def _nconv_gemm_kernel(at_ref, x_ref, o_ref):
    # at_ref: (tw, Vp)  block of A^T   (LHS, contract last dim)
    # x_ref : (Vp, tm)  block of X     (RHS, contract first dim)
    # o_ref : (tw, tm)  lane-dense output block
    out = lax.dot_general(
        at_ref[...], x_ref[...],
        dimension_numbers=(((1,), (0,)), ((), ())),   # standard contraction
        preferred_element_type=jnp.float32,
    )
    o_ref[...] = out.astype(o_ref.dtype)


def _round_up(x, m):
    return (x + m - 1) // m * m


def nconv(x, A, *, tm=512, tw=256, compute_dtype=None):
    """x: (N, C, V, L), A: (V, W) -> (N, C, W, L); matches torch.einsum('ncvl,vw->ncwl').

    compute_dtype: optionally cast x/A (e.g. jnp.bfloat16) before the matmul;
    accumulation stays f32. Default keeps the input dtype (bit-faithful to the
    PyTorch module's f32 forward).
    """
    N, C, V, L = x.shape
    Va, W = A.shape
    assert V == Va, "node dim mismatch"
    out_dtype = x.dtype

    if compute_dtype is not None:
        x = x.astype(compute_dtype)
        A = A.astype(compute_dtype)

    M = N * C * L

    # Lane-dense repack (layout plumbing in the wrapper, not compute):
    #   X[v, m]  with m = (n*C + c)*L + l
    x2 = jnp.transpose(x, (2, 0, 1, 3)).reshape(V, M)
    at = A.T  # (W, V): pre-transposed once so the kernel never transposes per step.

    # Tile sizes: output lanes (M axis) in multiples of 128; W axis in multiples
    # of 8 (sublane). Contraction depth V padded to a sublane multiple and kept
    # as one full block (no K tiling needed for V ~ O(200)).
    tm = min(tm, _round_up(M, 128))
    tw = min(tw, _round_up(W, 8))
    Vp = _round_up(V, 8)
    Mp = _round_up(M, tm)
    Wp = _round_up(W, tw)

    at_p = jnp.pad(at, ((0, Wp - W), (0, Vp - V)))
    x2_p = jnp.pad(x2, ((0, Vp - V), (0, Mp - M)))

    grid = (Wp // tw, Mp // tm)

    out_p = pl.pallas_call(
        _nconv_gemm_kernel,
        out_shape=jax.ShapeDtypeStruct((Wp, Mp), out_dtype),
        grid_spec=pltpu.PrefetchScalarGridSpec(
            num_scalar_prefetch=0,
            grid=grid,
            in_specs=[
                # A^T block: changes only with the W-block index -> stays
                # resident while the lane (M) axis iterates.
                pl.BlockSpec((tw, Vp), lambda i, j: (i, 0)),
                # X block: full contraction depth, lane-dense tm columns.
                pl.BlockSpec((Vp, tm), lambda i, j: (0, j)),
            ],
            out_specs=pl.BlockSpec((tw, tm), lambda i, j: (i, j)),
        ),
        compiler_params=pltpu.CompilerParams(
            dimension_semantics=("parallel", "parallel"),
        ),
    )(at_p, x2_p)

    # Unpad and restore NCWL layout.
    out = out_p[:W, :M].reshape(W, N, C, L)
    return jnp.transpose(out, (1, 2, 0, 3))


if __name__ == "__main__":
    key = jax.random.PRNGKey(0)
    kx, ka = jax.random.split(key)

    # Small shapes consistent with Graph-WaveNet usage: batch=2, channels=4,
    # num_nodes V=16, seq len L=8, A is (V, V).
    N, C, V, L = 2, 4, 16, 8
    x = jax.random.normal(kx, (N, C, V, L), dtype=jnp.float32)
    A = jax.random.normal(ka, (V, V), dtype=jnp.float32)

    out = nconv(x, A)
    out = jax.block_until_ready(out)

    # Reference check against plain JAX einsum (same semantics as torch.einsum).
    ref = jnp.einsum("ncvl,vw->ncwl", x, A)
    assert out.shape == ref.shape == (N, C, V, L)
    assert jnp.allclose(out, ref, atol=2e-5, rtol=2e-5), "mismatch vs reference"

    print("KERNEL_OK")
</pallas_src>

<mosaic_0001>
module attributes {stable_mosaic.version = 11 : i64} {
  func.func @_nconv_gemm_kernel(%arg0: i32, %arg1: i32, %arg2: memref<16x16xf32, #tpu.memory_space<vmem>>, %arg3: memref<16x128xf32, #tpu.memory_space<vmem>>, %arg4: memref<16x128xf32, #tpu.memory_space<vmem>>) attributes {dimension_semantics = [#tpu.dimension_semantics<parallel>, #tpu.dimension_semantics<parallel>], iteration_bounds = array<i64: 1, 1>, scalar_prefetch = 0 : i64, scratch_operands = 0 : i64, tpu.core_type = #tpu.core_type<tc>, window_params = [{transform_indices = @transform_0, window_bounds = array<i64: 16, 16>}, {transform_indices = @transform_1, window_bounds = array<i64: 16, 128>}, {transform_indices = @transform_2, window_bounds = array<i64: 16, 128>}]} {
    %c0 = arith.constant 0 : index
    %c0_0 = arith.constant 0 : index
    %0 = vector.load %arg2[%c0, %c0_0] : memref<16x16xf32, #tpu.memory_space<vmem>>, vector<16x16xf32>
    %c0_1 = arith.constant 0 : index
    %c0_2 = arith.constant 0 : index
    %1 = vector.load %arg3[%c0_1, %c0_2] : memref<16x128xf32, #tpu.memory_space<vmem>>, vector<16x128xf32>
    %cst = arith.constant dense<0.000000e+00> : vector<16x128xf32>
    %2 = tpu.matmul %0, %1, %cst {dimension_numbers = #tpu.dot_dimension_numbers<[1], [0], [0], [1], [0, 0, 1, 1], [], []>} : vector<16x16xf32>, vector<16x128xf32>, vector<16x128xf32> -> vector<16x128xf32>
    %c0_3 = arith.constant 0 : index
    %c0_4 = arith.constant 0 : index
    %3 = vector.load %arg4[%c0_3, %c0_4] : memref<16x128xf32, #tpu.memory_space<vmem>>, vector<16x128xf32>
    tpu.vector_store %arg4[%c0_3, %c0_4], %2 {strides = array<i32>} : memref<16x128xf32, #tpu.memory_space<vmem>>, vector<16x128xf32>,
    return
  }
  func.func @transform_0(%arg0: i32, %arg1: i32) -> (i32, i32) {
    %c0_i32 = arith.constant 0 : i32
    %c0_i32_0 = arith.constant 0 : i32
    return %arg0, %c0_i32 : i32, i32
  }
  func.func @transform_1(%arg0: i32, %arg1: i32) -> (i32, i32) {
    %c0_i32 = arith.constant 0 : i32
    %c0_i32_0 = arith.constant 0 : i32
    return %c0_i32, %arg1 : i32, i32
  }
  func.func @transform_2(%arg0: i32, %arg1: i32) -> (i32, i32) {
    %c0_i32 = arith.constant 0 : i32
    return %arg0, %arg1 : i32, i32
  }
}

</mosaic_0001>

<bundles_post_ra>
// kernel: tpu_custom_call.1
= control target key start
LH: loop header
LB: loop body
LE: loop exit
PB: predicated region body
PF: predicated region fallthrough
CT: control target
= control target key end

     0   :  { %7 = vsyncpa [#allocation3], 0  ;;  %s225_s0 = inlined_call_operand.hbm [shape: f32[16,16], index: 0, kind: input, shape index: {}]   ;;  %s226_s1 = inlined_call_operand.hbm [shape: f32[16,128], index: 1, kind: input, shape index: {}]   ;;  %s227_s2 = inlined_call_operand.hbm [shape: f32[16,128], index: 2, kind: output, shape index: {}]  }
   0x1   :  { %8 = vsyncpa [#allocation6], 0 }
   0x2   :  { %9 = vsyncpa [#allocation4], 0  ;;  %s14_s11 = sshll.u32 %s225_s0, 4  ;;  %s187_s12 = smov [#allocation2]   ;;  %s15_s11 = int_to_ptr.hbm [resolvable:$true] %s14_s11 }
   0x3   :  { %s16_s13 = sshll.u32 %s187_s12, 4  ;;  %s27_s16 = sshll.u32 %s226_s1, 4  ;;  %s17_s13 = int_to_ptr.vmem [resolvable:$true] %s16_s13  ;;  %s28_s16 = int_to_ptr.hbm [resolvable:$true] %s27_s16 }
   0x4   :  { %s188_s17 = smov 128   ;;  %s189_s18 = smov 8  }
   0x5   :  { %22 = dma.hbm_to_vmem [thread:$0]  %s15_s11, 256, %s17_s13, [#allocation3], %s188_s17, %s188_s17, %s189_s18  }
   0x6   :  { %s190_s19 = smov [#allocation5]  }
   0x7   :  { %s29_s20 = sshll.u32 %s190_s19, 4  ;;  %s30_s20 = int_to_ptr.vmem [resolvable:$true] %s29_s20 }
   0x8   :  { %35 = dma.hbm_to_vmem [thread:$0]  %s28_s16, 256, %s30_s20, [#allocation6], %s188_s17, %s188_s17, %s189_s18  }
   0x9   :  { %181 = dma.done.wait [#allocation3], 256  }
   0xa   :  { %182 = vsyncadd [#allocation3], 4294967040 }
   0xb   :  { %183 = dma.done.wait [#allocation6], 256  }
   0xc   :  { %184 = vsyncadd [#allocation6], 4294967040  ;;  %v47_v0 = vld [vmem:[#allocation5 + $0x8] sm:$0xff]  ;;  %v46_v1 = vld [vmem:[#allocation5] sm:$0xff]  ;;  %vm48_vm0 = vcmask 130048   ;;  %s191_s0 = smov [#allocation7]  }
   0xd   :  { %69 = vmatpush.msra.mxu0 %v47_v0  ;;  %102 = vmatpush.msra.mxu1 %v47_v0  ;;  %v44_v2 = vld [vmem:[#allocation2] sm:$0xff]  ;;  %v45_v3 = vld [vmem:[#allocation2 + $0x8] sm:$0xff]  ;;  %s84_s1 = sshll.u32 %s191_s0, 4  ;;  %s86_s23 = sshll.u32 %s227_s2, 4  ;;  %s85_s1 = int_to_ptr.vmem [resolvable:$true] %s84_s1  ;;  %s87_s23 = int_to_ptr.hbm [resolvable:$true] %s86_s23 }
   0xf   :  { %70 = vmatpush.msra.mxu0 %v46_v1  ;;  %103 = vmatpush.msra.mxu1 %v46_v1 }
  0x10   :  { %100 = vmatmul.msk.f32.vlgmr.msra.gmra.mxu0 %vm48_vm0, %v44_v2  ;;  %101 = vmatmul.msk.f32.vlgmr.msra.gmra.mxu1 %vm48_vm0, %v45_v3 }
  0x8d   :  { %v72_v4 = vpop.f32.mrf.mxu0  ;;  %v75_v5 = vpop.f32.mrf.mxu1 }
  0x8e   :  { %78 = vst [vmem:[#allocation7] sm:$0xff] %v72_v4 }
  0x8f   :  { %79 = vst [vmem:[#allocation7 + $0x8] sm:$0xff] %v75_v5 }
  0x90   :  { %92 = dma.vmem_to_hbm [thread:$0]  %s85_s1, 256, %s87_s23, [#allocation4], %s188_s17, %s188_s17, %s189_s18  }
  0x91   :  { %185 = dma.done.wait [#allocation4], 256  }
  0x92   :  { %186 = vsyncadd [#allocation4], 4294967040 }
  0x93   :  { %97 = vsyncpa [#allocation3], 1 }
  0x94   :  { %98 = vsyncpa [#allocation6], 1 }
  0x95   :  { %99 = vsyncpa [#allocation4], 1 }

</bundles_post_ra>
